<compile_context>
chip_gen: v7x
topology: tpu7x:2x2x1
jax: 0.10.0
libtpu: 0.0.40
codegen_flags: <defaults>
</compile_context>

<pallas_src>
import functools
import numpy as np

import jax
import jax.numpy as jnp
from jax.experimental import pallas as pl
from jax.experimental.pallas import tpu as pltpu


# --------------------------- VMEM / tile budgeting ---------------------------

def _tpu_vmem_capacity():
    try:
        return int(pltpu.get_tpu_info().vmem_capacity_bytes)
    except Exception:
        return 128 * 1024 * 1024          # v5e / v6e default; v7x has 64 MiB


_VMEM_BYTES = _tpu_vmem_capacity()
# v5e/v6e (128 MiB): big row tiles amortize grid overhead & weight re-streams.
# v7x (64 MiB): keep row tiles modest so double-buffered streams + weights fit.
_ROW_CAP = 1024 if _VMEM_BYTES >= (96 << 20) else 256
_VMEM_LIMIT = int(min(_VMEM_BYTES * 3 // 4, 100 * 1024 * 1024))


def _row_tile(n):
    for t in (1024, 512, 256, 128):
        if t <= _ROW_CAP and n % t == 0:
            return t
    return n                              # small problem: one full block


def _k_tile(v):
    if v <= 512:
        return v
    for t in (512, 256, 128):
        if v % t == 0:
            return t
    return v


def _batch_block(b):
    """Batches handled per attention/tail grid step; keep >=2 steps (megacore)."""
    if b <= 2:
        return 1
    for kb in (4, 2):
        if b % kb == 0 and b // kb >= 2:
            return kb
    return 1


def _params(semantics):
    return pltpu.CompilerParams(dimension_semantics=semantics,
                                vmem_limit_bytes=_VMEM_LIMIT)


# ------------------------------ Pallas kernels ------------------------------

def _layer_norm(x, g, b):
    mu = jnp.mean(x, axis=-1, keepdims=True)
    var = jnp.mean((x - mu) ** 2, axis=-1, keepdims=True)
    return (x - mu) * jax.lax.rsqrt(var + 1e-5) * g + b


def _embed_kernel(dc_ref, t_ref, pos_ref,
                  w_pre_ref, b_pre_ref, w_sel_ref, b_sel_ref,
                  w_time_ref, b_time_ref, o_ref):
    # out = pre_embedding(x) + time_layer(1 - tanh(selection_layer(t/180)^2)) + pos
    # grid = (row_tiles, vocab_tiles); vocab is the (last) reduction axis.
    k = pl.program_id(1)

    @pl.when(k == 0)
    def _():
        o_ref[...] = jnp.zeros_like(o_ref)

    # dc already arrives bf16 (halved HBM stream); f32 accumulation on the MXU.
    o_ref[...] += jnp.dot(dc_ref[...], w_pre_ref[...],
                          preferred_element_type=jnp.float32)

    @pl.when(k == pl.num_programs(1) - 1)
    def _():
        t = t_ref[...] * (1.0 / 180.0)                         # (TM, 1)
        tf = t * w_sel_ref[...] + b_sel_ref[...]               # Linear(1, T)
        tf = 1.0 - jnp.tanh(tf * tf)
        tf = jnp.dot(tf.astype(jnp.bfloat16), w_time_ref[...],
                     preferred_element_type=jnp.float32) + b_time_ref[...]
        o_ref[...] = o_ref[...] + b_pre_ref[...] + tf + pos_ref[...]


def _qkv_kernel(x_ref, w_qkv_ref, b_qkv_ref, q_ref, k_ref, v_ref, *, scale):
    # one fused (TM, D) @ (D, 3D) projection; the attention scale is folded
    # into q here (uniform scalar, so the later raw head .view is unaffected).
    x = x_ref[...].astype(jnp.bfloat16)
    qkv = jnp.dot(x, w_qkv_ref[...],
                  preferred_element_type=jnp.float32) + b_qkv_ref[...]
    d = q_ref.shape[-1]
    q_ref[...] = (qkv[:, :d] * scale).astype(q_ref.dtype)
    k_ref[...] = qkv[:, d:2 * d].astype(k_ref.dtype)
    v_ref[...] = qkv[:, 2 * d:].astype(v_ref.dtype)


def _attn_tail_kernel(*refs, num_heads, kb, with_weight):
    if with_weight:
        (q_ref, k_ref, v_ref, bias_ref, res_ref,
         wo_ref, bo_ref, g1_ref, be1_ref,
         w1_ref, b1_ref, w2_ref, b2_ref, g2_ref, be2_ref,
         ww_ref, bw_ref, msk_ref,
         out_ref, wgt_ref, ctx_scr) = refs
    else:
        (q_ref, k_ref, v_ref, bias_ref, res_ref,
         wo_ref, bo_ref, g1_ref, be1_ref,
         w1_ref, b1_ref, w2_ref, b2_ref, g2_ref, be2_ref,
         out_ref, ctx_scr) = refs

    H = num_heads
    _, S, dh = q_ref.shape
    D = res_ref.shape[-1]
    R = kb * S                                                # rows of this step

    # ---- scaled dot-product attention over the kb*H heads of this step ----
    # (scale already folded into q; padding mask is an additive bias -> no
    #  (S,S) select; attention probs never leave VMEM.)
    q = q_ref[...]
    k = k_ref[...]
    v = v_ref[...]
    s = jnp.einsum('hqd,hkd->hqk', q, k,
                   preferred_element_type=jnp.float32) + bias_ref[...]
    mx = jnp.max(s, axis=-1, keepdims=True)
    e = jnp.exp(s - mx)
    a = e * pl.reciprocal(jnp.sum(e, axis=-1, keepdims=True), approx=True)
    ctx = jnp.einsum('hqk,hkd->hqd', a.astype(v.dtype), v,
                     preferred_element_type=jnp.float32)      # (kb*H, S, dh) f32
    # TODO(synk): for very long sequences, tile the query axis / use online
    # softmax so the (kb*H, S, S) score block stays within VMEM (v7x 64 MiB).

    # ---- torch's raw `.view(batch, -1, H*dh)` (NO head transpose): the flat
    # buffer is reinterpreted, i.e. output row t, lane chunk j = flat row t*H+j.
    # Reproduced exactly with strided sub-lane reads from a VMEM scratch. ----
    ctx_scr[...] = ctx.reshape(kb * H * S, dh).astype(ctx_scr.dtype)
    ctx_sd = jnp.concatenate(
        [ctx_scr[pl.ds(j, R, stride=H), :] for j in range(H)], axis=-1)  # (R, D)

    # ---- linear_final + residual + LayerNorm (MultiHeadAttention tail) ----
    res = res_ref[...].reshape(R, D)
    o = jnp.dot(ctx_sd, wo_ref[...],
                preferred_element_type=jnp.float32) + bo_ref[...]
    x = _layer_norm(res + o, g1_ref[...], be1_ref[...])

    # ---- position-wise FFN (Conv1d k=1) + residual + LayerNorm ----
    h = jnp.maximum(jnp.dot(x.astype(jnp.bfloat16), w1_ref[...],
                            preferred_element_type=jnp.float32) + b1_ref[...], 0.0)
    y = x + jnp.dot(h.astype(jnp.bfloat16), w2_ref[...],
                    preferred_element_type=jnp.float32) + b2_ref[...]
    y = _layer_norm(y, g2_ref[...], be2_ref[...])
    out_ref[...] = y.reshape(kb, S, D)

    if with_weight:
        # fused final weight layer: logits + softmax over the sequence axis
        # + visit mask (exact division here for parity with torch).
        lg = jnp.sum(y * ww_ref[...], axis=-1, keepdims=True) + bw_ref[...]  # (R, 1)
        lg = lg.reshape(kb, S, 1)
        lmx = jnp.max(lg, axis=1, keepdims=True)
        le = jnp.exp(lg - lmx)
        sm = le / jnp.sum(le, axis=1, keepdims=True)
        m = msk_ref[...]                                      # (kb, S, 1)
        wgt_ref[...] = sm * m - 255.0 * (1.0 - m)


# --------------------------- pallas_call wrappers ---------------------------

def embed_call(dc_flat, tstep, pos_emb, p):
    N, V = dc_flat.shape
    D = p["b_pre"].shape[1]
    T = p["w_sel"].shape[1]
    tm = _row_tile(N)
    tk = _k_tile(V)
    return pl.pallas_call(
        _embed_kernel,
        out_shape=jax.ShapeDtypeStruct((N, D), jnp.float32),
        grid=(N // tm, V // tk),
        in_specs=[
            pl.BlockSpec((tm, tk), lambda m, k: (m, k)),      # dc (bf16)
            pl.BlockSpec((tm, 1), lambda m, k: (m, 0)),       # t
            pl.BlockSpec((tm, D), lambda m, k: (m, 0)),       # pos
            pl.BlockSpec((tk, D), lambda m, k: (k, 0)),       # w_pre (bf16)
            pl.BlockSpec((1, D), lambda m, k: (0, 0)),        # b_pre
            pl.BlockSpec((1, T), lambda m, k: (0, 0)),        # w_sel
            pl.BlockSpec((1, T), lambda m, k: (0, 0)),        # b_sel
            pl.BlockSpec((T, D), lambda m, k: (0, 0)),        # w_time (bf16)
            pl.BlockSpec((1, D), lambda m, k: (0, 0)),        # b_time
        ],
        out_specs=pl.BlockSpec((tm, D), lambda m, k: (m, 0)),
        compiler_params=_params(("parallel", "arbitrary")),
    )(dc_flat, tstep, pos_emb, p["w_pre"], p["b_pre"], p["w_sel"], p["b_sel"],
      p["w_time"], p["b_time"])


def qkv_call(x, lp, scale):
    N, D = x.shape
    tm = _row_tile(N)
    out_sd = jax.ShapeDtypeStruct((N, D), jnp.bfloat16)
    # TODO(synk): on v7x, mark the constant-index weight specs below with
    # pipeline_mode=pl.Buffered(1) so they are not double-buffered.
    return pl.pallas_call(
        functools.partial(_qkv_kernel, scale=scale),
        out_shape=(out_sd, out_sd, out_sd),
        grid=(N // tm,),
        in_specs=[
            pl.BlockSpec((tm, D), lambda m: (m, 0)),          # x
            pl.BlockSpec((D, 3 * D), lambda m: (0, 0)),       # w_qkv (bf16)
            pl.BlockSpec((1, 3 * D), lambda m: (0, 0)),       # b_qkv
        ],
        out_specs=(pl.BlockSpec((tm, D), lambda m: (m, 0)),) * 3,
        compiler_params=_params(("parallel",)),
    )(x, lp["w_qkv"], lp["b_qkv"])


def attn_tail_call(qh, kh, vh, head_bias, res_bsd, lp, *, num_heads, kb,
                   with_weight=False, w_weight=None, b_weight=None,
                   mask_bs1=None):
    BH, S, dh = qh.shape
    H = num_heads
    B = BH // H
    D = res_bsd.shape[-1]
    F = lp["w1"].shape[1]
    bmap = lambda g: (g, 0, 0)
    cmap = lambda g: (0, 0)

    in_specs = [
        pl.BlockSpec((kb * H, S, dh), bmap),   # q (scale pre-folded, bf16)
        pl.BlockSpec((kb * H, S, dh), bmap),   # k (bf16)
        pl.BlockSpec((kb * H, S, dh), bmap),   # v (bf16)
        pl.BlockSpec((kb * H, 1, S), bmap),    # additive key-padding bias
        pl.BlockSpec((kb, S, D), bmap),        # residual (layer input, f32)
        pl.BlockSpec((D, D), cmap),            # wo   (bf16)
        pl.BlockSpec((1, D), cmap),            # bo
        pl.BlockSpec((1, D), cmap),            # ln1 gamma
        pl.BlockSpec((1, D), cmap),            # ln1 beta
        pl.BlockSpec((D, F), cmap),            # w1   (bf16)
        pl.BlockSpec((1, F), cmap),            # b1
        pl.BlockSpec((F, D), cmap),            # w2   (bf16)
        pl.BlockSpec((1, D), cmap),            # b2
        pl.BlockSpec((1, D), cmap),            # ln2 gamma
        pl.BlockSpec((1, D), cmap),            # ln2 beta
    ]
    args = [qh, kh, vh, head_bias, res_bsd,
            lp["wo"], lp["bo"], lp["ln1_g"], lp["ln1_b"],
            lp["w1"], lp["b1"], lp["w2"], lp["b2"], lp["ln2_g"], lp["ln2_b"]]
    # TODO(synk): on v7x, pipeline_mode=pl.Buffered(1) on the constant weight
    # specs above would halve their VMEM footprint (they never change index).

    if with_weight:
        in_specs += [pl.BlockSpec((1, D), cmap),       # weight_layer W (stored (1, D))
                     pl.BlockSpec((1, 1), cmap),       # weight_layer b
                     pl.BlockSpec((kb, S, 1), bmap)]   # visit mask
        args += [w_weight, b_weight, mask_bs1]
        out_shape = (jax.ShapeDtypeStruct((B, S, D), jnp.float32),
                     jax.ShapeDtypeStruct((B, S, 1), jnp.float32))
        out_specs = (pl.BlockSpec((kb, S, D), bmap),
                     pl.BlockSpec((kb, S, 1), bmap))
    else:
        out_shape = jax.ShapeDtypeStruct((B, S, D), jnp.float32)
        out_specs = pl.BlockSpec((kb, S, D), bmap)

    return pl.pallas_call(
        functools.partial(_attn_tail_kernel, num_heads=H, kb=kb,
                          with_weight=with_weight),
        out_shape=out_shape,
        grid=(B // kb,),
        in_specs=in_specs,
        out_specs=out_specs,
        scratch_shapes=[pltpu.VMEM((kb * H * S, dh), jnp.bfloat16)],
        compiler_params=_params(("parallel",)),
    )(*args)


# ------------------------------- model glue --------------------------------

def make_positional_table(d_model, max_seq_len):
    pe = np.array([[pos / np.power(10000, 2.0 * (j // 2) / d_model)
                    for j in range(d_model)] for pos in range(max_seq_len)],
                  dtype=np.float64)
    pe[:, 0::2] = np.sin(pe[:, 0::2])
    pe[:, 1::2] = np.cos(pe[:, 1::2])
    table = np.concatenate([np.zeros((1, d_model)), pe], axis=0).astype(np.float32)
    return jnp.asarray(table)                                 # (max_seq_len + 1, D)


def encoder_forward(diagnosis_codes, mask, seq_time_step, input_len, params, cfg):
    H = cfg["num_heads"]
    D = cfg["model_dim"]
    dh = D // H

    # --- input permutes (torch .permute(1,0,2)); stream the big diagnosis
    #     tensor into the vocab matmul in bf16 (halves its HBM stream). ---
    dc = jnp.transpose(diagnosis_codes, (1, 0, 2)).astype(jnp.bfloat16)   # (B, S, V)
    mask_bs1 = jnp.transpose(mask, (1, 0, 2)).astype(jnp.float32)         # (B, S, 1)
    B, S, V = dc.shape
    N = B * S

    dc_flat = dc.reshape(N, V)
    tstep = seq_time_step.astype(jnp.float32).reshape(N, 1)

    # --- PositionalEncoding (index / table construction is glue) ---
    t_idx = jnp.arange(S, dtype=jnp.int32)
    pos = jnp.where(t_idx[None, :] < input_len[:, None], t_idx[None, :] + 1, 0)  # (B,S)
    pos_emb = jnp.take(params["pos_table"], pos, axis=0).reshape(N, D)

    # additive key-padding bias (padding_mask(ind_pos, ind_pos) -> masked_fill(-inf)).
    # torch's `attn_mask.repeat(H,1,1)` indexes batches as r % B while the raw
    # q/k/v .view indexes them as r // H; reproduce that indexing exactly.
    pad_bias = jnp.where(pos == 0, -1e30, 0.0).astype(jnp.float32)[:, None, :]   # (B,1,S)
    head_bias = pad_bias[jnp.arange(B * H) % B]                                  # (B*H,1,S)

    # --- embedding + time feature + positional encoding (K-tiled vocab matmul) ---
    output = embed_call(dc_flat, tstep, pos_emb, params)          # (N, D) f32

    # faithful torch quirk: scale = (dim_per_head // num_heads) ** (-0.5)
    # (like the reference module this fails if dim_per_head < num_heads).
    scale = float(dh // H) ** (-0.5)

    kb = _batch_block(B)
    n_layers = len(params["layers"])
    weight = None
    out_bsd = output.reshape(B, S, D)
    for li, lp in enumerate(params["layers"]):
        q, k, v = qkv_call(output, lp, scale)                     # (N, D) bf16 each
        # torch raw .view(B*H, -1, dh) with NO head transpose: contiguous data,
        # so this is a zero-copy reshape (the same flat-buffer reinterpretation
        # is inverted in-kernel after attention).
        qh = q.reshape(B * H, S, dh)
        kh = k.reshape(B * H, S, dh)
        vh = v.reshape(B * H, S, dh)
        res_bsd = output.reshape(B, S, D)
        if li == n_layers - 1:
            out_bsd, weight = attn_tail_call(
                qh, kh, vh, head_bias, res_bsd, lp, num_heads=H, kb=kb,
                with_weight=True, w_weight=params["w_weight"],
                b_weight=params["b_weight"], mask_bs1=mask_bs1)
        else:
            out_bsd = attn_tail_call(qh, kh, vh, head_bias, res_bsd, lp,
                                     num_heads=H, kb=kb)
        output = out_bsd.reshape(N, D)
        # TODO(synk): folding the QKV matmul into the per-batch kernel would also
        # remove the q/k/v HBM round-trips (needs in-kernel lane->sublane split).

    out_final = jnp.transpose(out_bsd, (1, 0, 2))                 # (S, B, D)
    weight_final = jnp.transpose(weight, (1, 0, 2))               # (S, B, 1)
    return out_final, weight_final


# ------------------------------- param init --------------------------------

def _linear(key, din, dout):
    bound = 1.0 / np.sqrt(din)
    kw, kb = jax.random.split(key)
    w = jax.random.uniform(kw, (din, dout), jnp.float32, -bound, bound)
    b = jax.random.uniform(kb, (1, dout), jnp.float32, -bound, bound)
    return w, b


def init_params(key, vocab_size, model_dim, num_heads, ffn_dim, time_dim,
                max_seq_len, num_layers):
    keys = jax.random.split(key, 4 + num_layers)
    p = {}
    w_pre, p["b_pre"] = _linear(keys[0], vocab_size, model_dim)
    p["w_pre"] = w_pre.astype(jnp.bfloat16)
    p["w_sel"], p["b_sel"] = _linear(keys[1], 1, time_dim)
    w_time, p["b_time"] = _linear(keys[2], time_dim, model_dim)
    p["w_time"] = w_time.astype(jnp.bfloat16)
    ww, bw = _linear(keys[3], model_dim, 1)
    p["w_weight"] = jnp.transpose(ww)         # stored (1, D): lane-friendly reduce
    p["b_weight"] = bw                        # (1, 1)
    p["pos_table"] = make_positional_table(model_dim, max_seq_len)
    layers = []
    for li in range(num_layers):
        lk = jax.random.split(keys[4 + li], 6)
        lp = {}
        wq, bq = _linear(lk[0], model_dim, model_dim)
        wk, bk = _linear(lk[1], model_dim, model_dim)
        wv, bv = _linear(lk[2], model_dim, model_dim)
        lp["w_qkv"] = jnp.concatenate([wq, wk, wv], axis=1).astype(jnp.bfloat16)
        lp["b_qkv"] = jnp.concatenate([bq, bk, bv], axis=1)
        wo, lp["bo"] = _linear(lk[3], model_dim, model_dim)
        lp["wo"] = wo.astype(jnp.bfloat16)
        w1, lp["b1"] = _linear(lk[4], model_dim, ffn_dim)      # Conv1d(D, F, 1)
        lp["w1"] = w1.astype(jnp.bfloat16)
        w2, lp["b2"] = _linear(lk[5], ffn_dim, model_dim)      # Conv1d(F, D, 1)
        lp["w2"] = w2.astype(jnp.bfloat16)
        lp["ln1_g"] = jnp.ones((1, model_dim), jnp.float32)
        lp["ln1_b"] = jnp.zeros((1, model_dim), jnp.float32)
        lp["ln2_g"] = jnp.ones((1, model_dim), jnp.float32)
        lp["ln2_b"] = jnp.zeros((1, model_dim), jnp.float32)
        layers.append(lp)
    p["layers"] = layers
    return p


# ---------------------------------- main -----------------------------------

if __name__ == "__main__":
    # Shapes consistent with the module's forward:
    #   diagnosis_codes: (S, B, V), mask: (S, B, 1), seq_time_step: (B, S),
    #   input_len: (B,).  time/selection layer dims scaled with model_dim.
    B, S, V = 2, 8, 32
    D, H, FFN, T = 128, 4, 256, 64
    NUM_LAYERS = 2
    MAX_SEQ_LEN = S

    cfg = dict(model_dim=D, num_heads=H)

    key = jax.random.PRNGKey(0)
    k_par, k_dc, k_ts = jax.random.split(key, 3)

    params = init_params(k_par, V, D, H, FFN, T, MAX_SEQ_LEN, NUM_LAYERS)

    diagnosis_codes = jax.random.normal(k_dc, (S, B, V), jnp.float32)
    seq_time_step = jax.random.uniform(k_ts, (B, S), jnp.float32, 0.0, 365.0)
    input_len = jnp.array([S, 5], dtype=jnp.int32)            # max length == S
    valid = (jnp.arange(S, dtype=jnp.int32)[:, None] < input_len[None, :])
    mask = valid.astype(jnp.float32)[:, :, None]              # (S, B, 1)

    out, weight = encoder_forward(diagnosis_codes, mask, seq_time_step,
                                  input_len, params, cfg)
    out = jax.block_until_ready(out)
    weight = jax.block_until_ready(weight)

    assert out.shape == (S, B, D) and weight.shape == (S, B, 1)
    assert bool(jnp.all(jnp.isfinite(out))) and bool(jnp.all(jnp.isfinite(weight)))
    print("KERNEL_OK")
</pallas_src>

<mosaic_0001>
module attributes {stable_mosaic.version = 11 : i64} {
  func.func @_embed_kernel(%arg0: i32, %arg1: i32, %arg2: memref<16x32xbf16, #tpu.memory_space<vmem>>, %arg3: memref<16x1xf32, #tpu.memory_space<vmem>>, %arg4: memref<16x128xf32, #tpu.memory_space<vmem>>, %arg5: memref<32x128xbf16, #tpu.memory_space<vmem>>, %arg6: memref<1x128xf32, #tpu.memory_space<vmem>>, %arg7: memref<1x64xf32, #tpu.memory_space<vmem>>, %arg8: memref<1x64xf32, #tpu.memory_space<vmem>>, %arg9: memref<64x128xbf16, #tpu.memory_space<vmem>>, %arg10: memref<1x128xf32, #tpu.memory_space<vmem>>, %arg11: memref<16x128xf32, #tpu.memory_space<vmem>>) attributes {dimension_semantics = [#tpu.dimension_semantics<parallel>, #tpu.dimension_semantics<arbitrary>], iteration_bounds = array<i64: 1, 1>, scalar_prefetch = 0 : i64, scratch_operands = 0 : i64, tpu.core_type = #tpu.core_type<tc>, window_params = [{transform_indices = @transform_0, window_bounds = array<i64: 16, 32>}, {transform_indices = @transform_1, window_bounds = array<i64: 16, 1>}, {transform_indices = @transform_2, window_bounds = array<i64: 16, 128>}, {transform_indices = @transform_3, window_bounds = array<i64: 32, 128>}, {pipeline_mode = #tpu.pipeline_mode<synchronous>, transform_indices = @transform_4, window_bounds = array<i64: 1, 128>}, {pipeline_mode = #tpu.pipeline_mode<synchronous>, transform_indices = @transform_5, window_bounds = array<i64: 1, 64>}, {pipeline_mode = #tpu.pipeline_mode<synchronous>, transform_indices = @transform_6, window_bounds = array<i64: 1, 64>}, {pipeline_mode = #tpu.pipeline_mode<synchronous>, transform_indices = @transform_7, window_bounds = array<i64: 64, 128>}, {pipeline_mode = #tpu.pipeline_mode<synchronous>, transform_indices = @transform_8, window_bounds = array<i64: 1, 128>}, {transform_indices = @transform_9, window_bounds = array<i64: 16, 128>}]} {
    %c0_i32 = arith.constant 0 : i32
    %0 = arith.cmpi eq, %arg1, %c0_i32 : i32
    %1 = arith.extui %0 : i1 to i32
    %c0_i32_0 = arith.constant 0 : i32
    %2 = arith.cmpi ne, %1, %c0_i32_0 : i32
    scf.if %2 {
      %cst_10 = arith.constant 0.000000e+00 : f32
      %12 = vector.broadcast %cst_10 : f32 to vector<16x128xf32>
      %c0_11 = arith.constant 0 : index
      %c0_12 = arith.constant 0 : index
      %13 = vector.load %arg11[%c0_11, %c0_12] : memref<16x128xf32, #tpu.memory_space<vmem>>, vector<16x128xf32>
      tpu.vector_store %arg11[%c0_11, %c0_12], %12 {strides = array<i32>} : memref<16x128xf32, #tpu.memory_space<vmem>>, vector<16x128xf32>,
    } else {
    }
    %c0 = arith.constant 0 : index
    %c0_1 = arith.constant 0 : index
    %3 = vector.load %arg11[%c0, %c0_1] : memref<16x128xf32, #tpu.memory_space<vmem>>, vector<16x128xf32>
    %c0_2 = arith.constant 0 : index
    %c0_3 = arith.constant 0 : index
    %4 = vector.load %arg2[%c0_2, %c0_3] : memref<16x32xbf16, #tpu.memory_space<vmem>>, vector<16x32xbf16>
    %c0_4 = arith.constant 0 : index
    %c0_5 = arith.constant 0 : index
    %5 = vector.load %arg5[%c0_4, %c0_5] : memref<32x128xbf16, #tpu.memory_space<vmem>>, vector<32x128xbf16>
    %cst = arith.constant dense<0.000000e+00> : vector<16x128xf32>
    %6 = tpu.matmul %4, %5, %cst {dimension_numbers = #tpu.dot_dimension_numbers<[1], [0], [0], [1], [0, 0, 1, 1], [], []>} : vector<16x32xbf16>, vector<32x128xbf16>, vector<16x128xf32> -> vector<16x128xf32>
    %7 = arith.addf %3, %6 : vector<16x128xf32>
    %c0_6 = arith.constant 0 : index
    %c0_7 = arith.constant 0 : index
    %8 = vector.load %arg11[%c0_6, %c0_7] : memref<16x128xf32, #tpu.memory_space<vmem>>, vector<16x128xf32>
    tpu.vector_store %arg11[%c0_6, %c0_7], %7 {strides = array<i32>} : memref<16x128xf32, #tpu.memory_space<vmem>>, vector<16x128xf32>,
    %c0_i32_8 = arith.constant 0 : i32
    %9 = arith.cmpi eq, %arg1, %c0_i32_8 : i32
    %10 = arith.extui %9 : i1 to i32
    %c0_i32_9 = arith.constant 0 : i32
    %11 = arith.cmpi ne, %10, %c0_i32_9 : i32
    scf.if %11 {
      %c0_10 = arith.constant 0 : index
      %c0_11 = arith.constant 0 : index
      %12 = vector.load %arg3[%c0_10, %c0_11] : memref<16x1xf32, #tpu.memory_space<vmem>>, vector<16x1xf32>
      %cst_12 = arith.constant 0.00555555569 : f32
      %13 = vector.broadcast %cst_12 : f32 to vector<16x1xf32>
      %14 = arith.mulf %12, %13 : vector<16x1xf32>
      %c0_13 = arith.constant 0 : index
      %c0_14 = arith.constant 0 : index
      %15 = vector.load %arg7[%c0_13, %c0_14] : memref<1x64xf32, #tpu.memory_space<vmem>>, vector<1x64xf32>
      %16 = vector.broadcast %14 : vector<16x1xf32> to vector<16x64xf32>
      %17 = vector.broadcast %15 : vector<1x64xf32> to vector<16x64xf32>
      %18 = arith.mulf %16, %17 : vector<16x64xf32>
      %c0_15 = arith.constant 0 : index
      %c0_16 = arith.constant 0 : index
      %19 = vector.load %arg8[%c0_15, %c0_16] : memref<1x64xf32, #tpu.memory_space<vmem>>, vector<1x64xf32>
      %20 = vector.broadcast %19 : vector<1x64xf32> to vector<16x64xf32>
      %21 = arith.addf %18, %20 : vector<16x64xf32>
      %22 = arith.mulf %21, %21 : vector<16x64xf32>
      %23 = math.tanh %22 : vector<16x64xf32>
      %cst_17 = arith.constant 1.000000e+00 : f32
      %24 = vector.broadcast %cst_17 : f32 to vector<16x64xf32>
      %25 = arith.subf %24, %23 : vector<16x64xf32>
      %26 = arith.truncf %25 : vector<16x64xf32> to vector<16x64xbf16>
      %c0_18 = arith.constant 0 : index
      %c0_19 = arith.constant 0 : index
      %27 = vector.load %arg9[%c0_18, %c0_19] : memref<64x128xbf16, #tpu.memory_space<vmem>>, vector<64x128xbf16>
      %cst_20 = arith.constant dense<0.000000e+00> : vector<16x128xf32>
      %28 = tpu.matmul %26, %27, %cst_20 {dimension_numbers = #tpu.dot_dimension_numbers<[1], [0], [0], [1], [0, 0, 1, 1], [], []>} : vector<16x64xbf16>, vector<64x128xbf16>, vector<16x128xf32> -> vector<16x128xf32>
      %c0_21 = arith.constant 0 : index
      %c0_22 = arith.constant 0 : index
      %29 = vector.load %arg10[%c0_21, %c0_22] : memref<1x128xf32, #tpu.memory_space<vmem>>, vector<1x128xf32>
      %30 = vector.broadcast %29 : vector<1x128xf32> to vector<16x128xf32>
      %31 = arith.addf %28, %30 : vector<16x128xf32>
      %c0_23 = arith.constant 0 : index
      %c0_24 = arith.constant 0 : index
      %32 = vector.load %arg11[%c0_23, %c0_24] : memref<16x128xf32, #tpu.memory_space<vmem>>, vector<16x128xf32>
      %c0_25 = arith.constant 0 : index
      %c0_26 = arith.constant 0 : index
      %33 = vector.load %arg6[%c0_25, %c0_26] : memref<1x128xf32, #tpu.memory_space<vmem>>, vector<1x128xf32>
      %34 = vector.broadcast %33 : vector<1x128xf32> to vector<16x128xf32>
      %35 = arith.addf %32, %34 : vector<16x128xf32>
      %36 = arith.addf %35, %31 : vector<16x128xf32>
      %c0_27 = arith.constant 0 : index
      %c0_28 = arith.constant 0 : index
      %37 = vector.load %arg4[%c0_27, %c0_28] : memref<16x128xf32, #tpu.memory_space<vmem>>, vector<16x128xf32>
      %38 = arith.addf %36, %37 : vector<16x128xf32>
      %c0_29 = arith.constant 0 : index
      %c0_30 = arith.constant 0 : index
      %39 = vector.load %arg11[%c0_29, %c0_30] : memref<16x128xf32, #tpu.memory_space<vmem>>, vector<16x128xf32>
      tpu.vector_store %arg11[%c0_29, %c0_30], %38 {strides = array<i32>} : memref<16x128xf32, #tpu.memory_space<vmem>>, vector<16x128xf32>,
    } else {
    }
    return
  }
  func.func @transform_0(%arg0: i32, %arg1: i32) -> (i32, i32) {
    %c0_i32 = arith.constant 0 : i32
    return %arg0, %arg1 : i32, i32
  }
  func.func @transform_1(%arg0: i32, %arg1: i32) -> (i32, i32) {
    %c0_i32 = arith.constant 0 : i32
    %c0_i32_0 = arith.constant 0 : i32
    return %arg0, %c0_i32 : i32, i32
  }
  func.func @transform_2(%arg0: i32, %arg1: i32) -> (i32, i32) {
    %c0_i32 = arith.constant 0 : i32
    %c0_i32_0 = arith.constant 0 : i32
    return %arg0, %c0_i32 : i32, i32
  }
  func.func @transform_3(%arg0: i32, %arg1: i32) -> (i32, i32) {
    %c0_i32 = arith.constant 0 : i32
    %c0_i32_0 = arith.constant 0 : i32
    return %arg1, %c0_i32 : i32, i32
  }
  func.func @transform_4(%arg0: i32, %arg1: i32) -> (i32, i32) {
    %c0_i32 = arith.constant 0 : i32
    %c0_i32_0 = arith.constant 0 : i32
    %c0_i32_1 = arith.constant 0 : i32
    return %c0_i32, %c0_i32_0 : i32, i32
  }
  func.func @transform_5(%arg0: i32, %arg1: i32) -> (i32, i32) {
    %c0_i32 = arith.constant 0 : i32
    %c0_i32_0 = arith.constant 0 : i32
    %c0_i32_1 = arith.constant 0 : i32
    return %c0_i32, %c0_i32_0 : i32, i32
  }
  func.func @transform_6(%arg0: i32, %arg1: i32) -> (i32, i32) {
    %c0_i32 = arith.constant 0 : i32
    %c0_i32_0 = arith.constant 0 : i32
    %c0_i32_1 = arith.constant 0 : i32
    return %c0_i32, %c0_i32_0 : i32, i32
  }
  func.func @transform_7(%arg0: i32, %arg1: i32) -> (i32, i32) {
    %c0_i32 = arith.constant 0 : i32
    %c0_i32_0 = arith.constant 0 : i32
    %c0_i32_1 = arith.constant 0 : i32
    return %c0_i32, %c0_i32_0 : i32, i32
  }
  func.func @transform_8(%arg0: i32, %arg1: i32) -> (i32, i32) {
    %c0_i32 = arith.constant 0 : i32
    %c0_i32_0 = arith.constant 0 : i32
    %c0_i32_1 = arith.constant 0 : i32
    return %c0_i32, %c0_i32_0 : i32, i32
  }
  func.func @transform_9(%arg0: i32, %arg1: i32) -> (i32, i32) {
    %c0_i32 = arith.constant 0 : i32
    %c0_i32_0 = arith.constant 0 : i32
    return %arg0, %c0_i32 : i32, i32
  }
}

</mosaic_0001>

<bundles_post_ra>
// kernel: tpu_custom_call.1
= control target key start
LH: loop header
LB: loop body
LE: loop exit
PB: predicated region body
PF: predicated region fallthrough
CT: control target
= control target key end

     0   :  { %14 = vsyncpa [#allocation3], 0  ;;  %s901_s0 = inlined_call_operand.hbm [shape: bf16[16,32], index: 0, kind: input, shape index: {}]   ;;  %s902_s1 = inlined_call_operand.hbm [shape: f32[16,1], index: 1, kind: input, shape index: {}]   ;;  %s903_s2 = inlined_call_operand.hbm [shape: f32[16,128], index: 2, kind: input, shape index: {}]   ;;  %s904_s3 = inlined_call_operand.hbm [shape: bf16[32,128], index: 3, kind: input, shape index: {}]   ;;  %s905_s4 = inlined_call_operand.hbm [shape: f32[1,128], index: 4, kind: input, shape index: {}]   ;;  %s906_s5 = inlined_call_operand.hbm [shape: f32[1,64], index: 5, kind: input, shape index: {}]   ;;  %s907_s6 = inlined_call_operand.hbm [shape: f32[1,64], index: 6, kind: input, shape index: {}]   ;;  %s908_s7 = inlined_call_operand.hbm [shape: bf16[64,128], index: 7, kind: input, shape index: {}]   ;;  %s909_s8 = inlined_call_operand.hbm [shape: f32[1,128], index: 8, kind: input, shape index: {}]   ;;  %s910_s9 = inlined_call_operand.hbm [shape: f32[16,128], index: 9, kind: output, shape index: {}]  }
   0x1   :  { %15 = vsyncpa [#allocation6], 0 }
   0x2   :  { %16 = vsyncpa [#allocation9], 0 }
   0x3   :  { %17 = vsyncpa [#allocation12], 0 }
   0x4   :  { %18 = vsyncpa [#allocation15], 0 }
   0x5   :  { %19 = vsyncpa [#allocation4], 0  ;;  %s696_s30 = smov [#allocation5]   ;;  %s464_s13 = scalar_lea.hbm %s902_s1, 256 }
   0x6   :  { %s37_s10 = sshll.u32 %s696_s30, 4  ;;  %p465_p0 = scmp.ne.s32.totalorder %s902_s1, %s464_s13  ;;  %s38_s10 = int_to_ptr.vmem [resolvable:$true] %s37_s10 }
   0x7   :  { %p468_p1 = scmp.lt.u32.totalorder %s464_s13, %s902_s1 }
   0x9   :  { %p470_p2 = pnand %p468_p1, %p465_p0 }
   0xb   :  { %473 = shalt.err (!%p470_p2)
}
   0xc   :  { %s474_s18 = scalar_lea.vmem %s38_s10, 256  ;;  %p479_p4 = scmp.lt.s32.totalorder %s38_s10, %s38_s10 }
   0xd   :  { %p475_p3 = scmp.ne.s32.totalorder %s38_s10, %s474_s18  ;;  %p480_p5 = scmp.lt.s32.totalorder %s474_s18, %s474_s18 }
   0xf   :  { %p481_p6 = por %p480_p5, %p479_p4 }
  0x11   :  { %p482_p7 = pnand %p481_p6, %p475_p3 }
  0x13   :  { %485 = shalt.err (!%p482_p7)
}
  0x14   :  { %s697_s19 = smov 128   ;;  %s698_s20 = smov 8  }
  0x15   :  { %43 = dma.hbm_to_vmem [thread:$0]  %s902_s1, 256, %s38_s10, [#allocation6], %s697_s19, %s697_s19, %s698_s20  }
  0x16   :  { %s699_s23 = smov [#allocation8]   ;;  %s700_s25 = smov [#allocation11]  }
  0x17   :  { %s61_s24 = sshll.u32 %s699_s23, 4  ;;  %s84_s26 = sshll.u32 %s700_s25, 4  ;;  %s62_s24 = int_to_ptr.vmem [resolvable:$true] %s61_s24  ;;  %s85_s26 = int_to_ptr.vmem [resolvable:$true] %s84_s26 }
  0x18   :  { %s486_s29 = scalar_lea.hbm %s904_s3, 256 }
  0x19   :  { %p487_p8 = scmp.ne.s32.totalorder %s904_s3, %s486_s29  ;;  %p490_p9 = scmp.lt.u32.totalorder %s486_s29, %s904_s3 }
  0x1b   :  { %p492_p10 = pnand %p490_p9, %p487_p8 }
  0x1d   :  { %495 = shalt.err (!%p492_p10)
}
  0x1e   :  { %s496_s1 = scalar_lea.vmem %s62_s24, 256  ;;  %p501_p12 = scmp.lt.s32.totalorder %s62_s24, %s62_s24 }
  0x1f   :  { %p497_p11 = scmp.ne.s32.totalorder %s62_s24, %s496_s1  ;;  %p502_p13 = scmp.lt.s32.totalorder %s496_s1, %s496_s1 }
  0x21   :  { %p503_p0 = por %p502_p13, %p501_p12 }
  0x23   :  { %p504_p1 = pnand %p503_p0, %p497_p11 }
  0x25   :  { %507 = shalt.err (!%p504_p1)
}
  0x26   :  { %s701_s10 = smov 64   ;;  %s702_s14 = smov 4  }
  0x27   :  { %67 = dma.hbm_to_vmem [thread:$0]  %s904_s3, 256, %s62_s24, [#allocation9], %s701_s10, %s701_s10, %s702_s14  }
  0x28   :  { %s508_s21 = scalar_lea.hbm %s906_s5, 16 }
  0x29   :  { %p509_p2 = scmp.ne.s32.totalorder %s906_s5, %s508_s21  ;;  %p512_p3 = scmp.lt.u32.totalorder %s508_s21, %s906_s5 }
  0x2b   :  { %p514_p4 = pnand %p512_p3, %p509_p2 }
  0x2d   :  { %517 = shalt.err (!%p514_p4)
}
  0x2e   :  { %s518_s28 = scalar_lea.vmem %s85_s26, 16  ;;  %s522_s29 = scalar_lea.vmem %s85_s26, 32 }
  0x2f   :  { %p519_p5 = scmp.ne.s32.totalorder %s85_s26, %s518_s28  ;;  %p523_p6 = scmp.lt.s32.totalorder %s85_s26, %s85_s26 }
  0x30   :  { %p524_p7 = scmp.lt.s32.totalorder %s522_s29, %s518_s28 }
  0x32   :  { %p525_p8 = por %p524_p7, %p523_p6 }
  0x34   :  { %p526_p9 = pnand %p525_p8, %p519_p5 }
  0x36   :  { %529 = shalt.err (!%p526_p9)
}
  0x37   :  { %87 = dma.hbm_to_vmem [thread:$0]  %s906_s5, 16, %s85_s26, [#allocation12]  }
  0x38   :  { %s703_s30 = smov [#allocation14]   ;;  %s704_s12 = smov [#allocation2]  }
  0x39   :  { %s103_s11 = sshll.u32 %s703_s30, 4  ;;  %s25_s13 = sshll.u32 %s704_s12, 4  ;;  %s104_s11 = int_to_ptr.vmem [resolvable:$true] %s103_s11  ;;  %s26_s13 = int_to_ptr.vmem [resolvable:$true] %s25_s13 }
  0x3a   :  { %s530_s16 = scalar_lea.hbm %s908_s7, 512 }
  0x3b   :  { %p531_p10 = scmp.ne.s32.totalorder %s908_s7, %s530_s16  ;;  %p534_p11 = scmp.lt.u32.totalorder %s530_s16, %s908_s7 }
  0x3d   :  { %p536_p12 = pnand %p534_p11, %p531_p10 }
  0x3f   :  { %539 = shalt.err (!%p536_p12)
}
  0x40   :  { %s540_s5 = scalar_lea.vmem %s104_s11, 512  ;;  %p545_p0 = scmp.lt.s32.totalorder %s104_s11, %s104_s11 }
  0x41   :  { %p541_p13 = scmp.ne.s32.totalorder %s104_s11, %s540_s5  ;;  %p546_p1 = scmp.lt.s32.totalorder %s540_s5, %s540_s5 }
  0x43   :  { %p547_p2 = por %p546_p1, %p545_p0 }
  0x45   :  { %p548_p3 = pnand %p547_p2, %p541_p13 }
  0x47   :  { %551 = shalt.err (!%p548_p3)
}
  0x48   :  { %109 = dma.hbm_to_vmem [thread:$0]  %s908_s7, 512, %s104_s11, [#allocation15], %s701_s10, %s701_s10, %s702_s14  }
  0x49   :  { %s552_s28 = scalar_lea.hbm %s901_s0, 128 }
  0x4a   :  { %p553_p4 = scmp.ne.s32.totalorder %s901_s0, %s552_s28  ;;  %p556_p5 = scmp.lt.u32.totalorder %s552_s28, %s901_s0 }
  0x4c   :  { %p558_p6 = pnand %p556_p5, %p553_p4 }
  0x4e   :  { %561 = shalt.err (!%p558_p6)
}
  0x4f   :  { %s562_s12 = scalar_lea.vmem %s26_s13, 128  ;;  %p567_p8 = scmp.lt.s32.totalorder %s26_s13, %s26_s13 }
  0x50   :  { %p563_p7 = scmp.ne.s32.totalorder %s26_s13, %s562_s12  ;;  %p568_p9 = scmp.lt.s32.totalorder %s562_s12, %s562_s12 }
  0x52   :  { %p569_p10 = por %p568_p9, %p567_p8 }
  0x54   :  { %p570_p11 = pnand %p569_p10, %p563_p7 }
  0x56   :  { %573 = shalt.err (!%p570_p11)
}
  0x57   :  { %31 = dma.hbm_to_vmem [thread:$0]  %s901_s0, 128, %s26_s13, [#allocation3], %s701_s10, %s701_s10, %s702_s14  }
  0x58   :  { %s705_s1 = smov [#allocation7]   ;;  %s706_s16 = smov [#allocation10]  }
  0x59   :  { %s49_s15 = sshll.u32 %s705_s1, 4  ;;  %s74_s17 = sshll.u32 %s706_s16, 4  ;;  %s50_s15 = int_to_ptr.vmem [resolvable:$true] %s49_s15  ;;  %s75_s17 = int_to_ptr.vmem [resolvable:$true] %s74_s17 }
  0x5a   :  { %s574_s22 = scalar_lea.hbm %s903_s2, 256 }
  0x5b   :  { %p575_p12 = scmp.ne.s32.totalorder %s903_s2, %s574_s22  ;;  %p578_p13 = scmp.lt.u32.totalorder %s574_s22, %s903_s2 }
  0x5d   :  { %p580_p0 = pnand %p578_p13, %p575_p12 }
  0x5f   :  { %583 = shalt.err (!%p580_p0)
}
  0x60   :  { %s584_s0 = scalar_lea.vmem %s50_s15, 256  ;;  %p589_p2 = scmp.lt.s32.totalorder %s50_s15, %s50_s15 }
  0x61   :  { %p585_p1 = scmp.ne.s32.totalorder %s50_s15, %s584_s0  ;;  %p590_p3 = scmp.lt.s32.totalorder %s584_s0, %s584_s0 }
  0x63   :  { %p591_p4 = por %p590_p3, %p589_p2 }
  0x65   :  { %p592_p5 = pnand %p591_p4, %p585_p1 }
  0x67   :  { %595 = shalt.err (!%p592_p5)
}
  0x68   :  { %55 = dma.hbm_to_vmem [thread:$0]  %s903_s2, 256, %s50_s15, [#allocation6], %s697_s19, %s697_s19, %s698_s20  }
  0x69   :  { %s596_s28 = scalar_lea.hbm %s905_s4, 16 }
  0x6a   :  { %p597_p6 = scmp.ne.s32.totalorder %s905_s4, %s596_s28  ;;  %p600_p7 = scmp.lt.u32.totalorder %s596_s28, %s905_s4 }
  0x6c   :  { %p602_p8 = pnand %p600_p7, %p597_p6 }
  0x6e   :  { %605 = shalt.err (!%p602_p8)
}
  0x6f   :  { %s606_s12 = scalar_lea.vmem %s75_s17, 16  ;;  %s610_s7 = scalar_lea.vmem %s75_s17, 32 }
  0x70   :  { %p607_p9 = scmp.ne.s32.totalorder %s75_s17, %s606_s12  ;;  %p611_p10 = scmp.lt.s32.totalorder %s75_s17, %s75_s17 }
  0x71   :  { %p612_p11 = scmp.lt.s32.totalorder %s610_s7, %s606_s12 }
  0x73   :  { %p613_p12 = por %p612_p11, %p611_p10 }
  0x75   :  { %p614_p13 = pnand %p613_p12, %p607_p9 }
  0x77   :  { %617 = shalt.err (!%p614_p13)
}
  0x78   :  { %77 = dma.hbm_to_vmem [thread:$0]  %s905_s4, 16, %s75_s17, [#allocation9]  }
  0x79   :  { %s707_s1 = smov [#allocation13]   ;;  %s708_s16 = smov [#allocation16]  }
  0x7a   :  { %s94_s15 = sshll.u32 %s707_s1, 4  ;;  %s116_s18 = sshll.u32 %s708_s16, 4  ;;  %s95_s15 = int_to_ptr.vmem [resolvable:$true] %s94_s15  ;;  %s117_s18 = int_to_ptr.vmem [resolvable:$true] %s116_s18 }
  0x7b   :  { %s618_s5 = scalar_lea.hbm %s907_s6, 16 }
  0x7c   :  { %p619_p0 = scmp.ne.s32.totalorder %s907_s6, %s618_s5  ;;  %p622_p1 = scmp.lt.u32.totalorder %s618_s5, %s907_s6 }
  0x7e   :  { %p624_p2 = pnand %p622_p1, %p619_p0 }
  0x80   :  { %627 = shalt.err (!%p624_p2)
}
  0x81   :  { %s628_s4 = scalar_lea.vmem %s95_s15, 16  ;;  %s632_s17 = scalar_lea.vmem %s95_s15, 32 }
  0x82   :  { %p629_p3 = scmp.ne.s32.totalorder %s95_s15, %s628_s4  ;;  %p633_p4 = scmp.lt.s32.totalorder %s95_s15, %s95_s15 }
  0x83   :  { %p634_p5 = scmp.lt.s32.totalorder %s632_s17, %s628_s4 }
  0x85   :  { %p635_p6 = por %p634_p5, %p633_p4 }
  0x87   :  { %p636_p7 = pnand %p635_p6, %p629_p3 }
  0x89   :  { %639 = shalt.err (!%p636_p7)
}
  0x8a   :  { %97 = dma.hbm_to_vmem [thread:$0]  %s907_s6, 16, %s95_s15, [#allocation12]  }
  0x8b   :  { %s640_s28 = scalar_lea.hbm %s909_s8, 16 }
  0x8c   :  { %p641_p8 = scmp.ne.s32.totalorder %s909_s8, %s640_s28  ;;  %p644_p9 = scmp.lt.u32.totalorder %s640_s28, %s909_s8 }
  0x8e   :  { %p646_p10 = pnand %p644_p9, %p641_p8 }
  0x90   :  { %649 = shalt.err (!%p646_p10)
}
  0x91   :  { %s650_s12 = scalar_lea.vmem %s117_s18, 16  ;;  %s654_s7 = scalar_lea.vmem %s117_s18, 32 }
  0x92   :  { %p651_p11 = scmp.ne.s32.totalorder %s117_s18, %s650_s12  ;;  %p655_p12 = scmp.lt.s32.totalorder %s117_s18, %s117_s18 }
  0x93   :  { %p656_p13 = scmp.lt.s32.totalorder %s654_s7, %s650_s12 }
  0x95   :  { %p657_p0 = por %p656_p13, %p655_p12 }
  0x97   :  { %p658_p1 = pnand %p657_p0, %p651_p11 }
  0x99   :  { %661 = shalt.err (!%p658_p1)
}
  0x9a   :  { %119 = dma.hbm_to_vmem [thread:$0]  %s909_s8, 16, %s117_s18, [#allocation15]  }
  0x9b   :  { %684 = dma.done.wait [#allocation3], 128  }
  0x9c   :  { %685 = vsyncadd [#allocation3], 4294967168 }
  0x9d   :  { %686 = dma.done.wait [#allocation6], 512  }
  0x9e   :  { %687 = vsyncadd [#allocation6], 4294966784 }
  0x9f   :  { %688 = dma.done.wait [#allocation9], 272  }
  0xa0   :  { %689 = vsyncadd [#allocation9], 4294967024 }
  0xa1   :  { %690 = dma.done.wait [#allocation12], 32  }
  0xa2   :  { %691 = vsyncadd [#allocation12], 4294967264 }
  0xa3   :  { %692 = dma.done.wait [#allocation15], 528  }
  0xa4   :  { %693 = vsyncadd [#allocation15], 4294966768  ;;  %v709_v0 = vmov 0   ;;  %v231_v1 = vld [vmem:[#allocation5] sm:$0xff]  ;;  %v232_v2 = vld [vmem:[#allocation5 + $0x8] sm:$0xff]  ;;  %v710_v6 = vmov 0.0  }
  0xa5   :  { %452 = vset.pattern.permute.xlu0 %v709_v0  ;;  %v233_v3 = vmul.f32 0.0055555557, %v231_v1  ;;  %v234_v4 = vmul.f32 0.0055555557, %v232_v2  ;;  %v455_v5 = vld [vmem:[#allocation14] sm:$0xff]   ;;  %415 = vmatprep.subr.bf16.mxu0 %v710_v6  ;;  %v453_v7 = vld [vmem:[#allocation8] sm:$0xff]  }
  0xa6   :  { %423 = vmatprep.subr.bf16.mxu1 %v710_v6  ;;  %v457_v8 = vld [vmem:[#allocation14 + $0x8] sm:$0xff]   ;;  %416 = vmatpush3.bf16.msra.mxu0 %v453_v7  ;;  %v454_v9 = vld [vmem:[#allocation8 + $0x8] sm:$0xff]   ;;  %vm711_vm0 = vmmov 0   ;;  %vm179_vm1 = vcmask 261120   ;;  %v398_v13 = vld [vmem:[#allocation11] ss:$0 sm:$0xff] }
  0xa7   :  { %238 = vperm.xlu0 %452, %v233_v3   ;;  %424 = vmatpush3.bf16.msra.mxu1 %v455_v5  ;;  %v458_v10 = vld [vmem:[#allocation14 + $0x10] sm:$0xff]   ;;  %v456_v11 = vld [vmem:[#allocation2] sm:$0xff]   ;;  %v459_v12 = vld [vmem:[#allocation14 + $0x18] sm:$0xff]   ;;  %vm309_vm2 = vcmask 523264   ;;  %s712_s8 = smov [#allocation17]  }
  0xa8   :  { %425 = vmatprep.subr.bf16.mxu1 %v710_v6  ;;  %417 = vmatprep.subr.bf16.mxu0 %v710_v6  ;;  %v399_v14 = vld [vmem:[#allocation13] ss:$0 sm:$0xff]  ;;  %v406_v32 = vld [vmem:[#allocation10] ss:$0 sm:$0xff]  ;;  %v400_v33 = vld [vmem:[#allocation16] ss:$0 sm:$0xff] }
  0xa9   :  { %419 = vmatprep.mubr.msk.bf16.mxu0 %vm711_vm0, %v710_v6  ;;  %431 = vmatprep.mubr.msk.bf16.mxu1 %vm711_vm0, %v710_v6  ;;  %v367_v38 = vld [vmem:[#allocation7] sm:$0xff]  ;;  %v368_v44 = vld [vmem:[#allocation7 + $0x8] sm:$0xff]  ;;  %s378_s11 = sshll.u32 %s712_s8, 4  ;;  %s379_s11 = int_to_ptr.vmem [resolvable:$true] %s378_s11 }
  0xaa   :  { %418 = vmatpush3.bf16.msra.mxu0 %v454_v9  ;;  %s662_s1 = scalar_lea.vmem %s379_s11, 256  ;;  %p667_p3 = scmp.lt.s32.totalorder %s379_s11, %s379_s11 }
  0xab   :  { %243 = vperm.xlu0 %452, %v234_v4   ;;  %426 = vmatpush3.bf16.msra.mxu1 %v457_v8  ;;  %p663_p2 = scmp.ne.s32.totalorder %s379_s11, %s662_s1  ;;  %p668_p4 = scmp.lt.s32.totalorder %s662_s1, %s662_s1 }
  0xac   :  { %427 = vmatprep.subr.bf16.mxu1 %v710_v6 }
  0xad   :  { %420 = vmatmul.mubr.msk.bf16.vlgmr.msra.gmra.mrb[0].mxu0 %vm179_vm1, %v456_v11  ;;  %p669_p5 = por %p668_p4, %p667_p3 }
  0xaf   :  { %428 = vmatpush3.bf16.msra.mxu1 %v458_v10  ;;  %p670_p6 = pnand %p669_p5, %p663_p2 }
  0xb0   :  { %429 = vmatprep.subr.bf16.mxu1 %v710_v6 }
  0xb3   :  { %430 = vmatpush3.bf16.msra.mxu1 %v459_v12 }
 0x126   :  { %v239_v15 = vpop.permute.xlu0 %238 }
 0x127   :  { %v252_v16 = vmul.f32 %v398_v13, %v239_v15 }
 0x129   :  { %v261_v17 = vadd.f32 %v399_v14, %v252_v16 }
 0x12a   :  { %v244_v18 = vpop.permute.xlu0 %243 }
 0x12b   :  { %v263_v19 = vmul.f32 %v261_v17, %v261_v17  ;;  %v253_v20 = vmul.f32 %v398_v13, %v244_v18 }
 0x12d   :  { %v262_v21 = vadd.f32 %v399_v14, %v253_v20  ;;  %460 = vtanh.f32 %v263_v19 }
 0x12f   :  { %v264_v22 = vmul.f32 %v262_v21, %v262_v21 }
 0x131   :  { %462 = vtanh.f32 %v264_v22 }
 0x137   :  { %v461_v23 = vpop.eup %460 }
 0x138   :  { %v267_v25 = vsub.f32 1.0, %v461_v23 }
 0x13b   :  { %v463_v24 = vpop.eup %462 }
 0x13c   :  { %v268_v26 = vsub.f32 1.0, %v463_v24 }
 0x13e   :  { %v269_v27 = vpack.c.bf16 %v268_v26, %v267_v25 }
 0x140   :  { %432 = vmatmul.mubr.msk.bf16.vlgmr.msra.gmra.mrb[0].mxu1 %vm309_vm2, %v269_v27 }
 0x180   :  { %v217_v28 = vpop.f32.mrb[0].mxu0 }
 0x181   :  { %v421_v29 = vpop.f32.mrb[1].mxu0  ;;  %v363_v34 = vadd.f32 %v406_v32, %v217_v28 }
 0x182   :  { %v220_v30 = vpop.f32.mrb[2].mxu0 }
 0x183   :  { %v422_v31 = vpop.f32.mrb[3].mxu0  ;;  %v364_v42 = vadd.f32 %v406_v32, %v220_v30 }
 0x213   :  { %v347_v35 = vpop.f32.mrb[0].mxu1 }
 0x214   :  { %v348_v36 = vadd.f32 %v400_v33, %v347_v35  ;;  %v433_v37 = vpop.f32.mrb[1].mxu1 }
 0x215   :  { %v350_v39 = vpop.f32.mrb[2].mxu1 }
 0x216   :  { %v365_v40 = vadd.f32 %v363_v34, %v348_v36  ;;  %v351_v41 = vadd.f32 %v400_v33, %v350_v39  ;;  %v434_v43 = vpop.f32.mrb[3].mxu1 }
 0x218   :  { %v369_v45 = vadd.f32 %v367_v38, %v365_v40  ;;  %v366_v46 = vadd.f32 %v364_v42, %v351_v41 }
 0x21a   :  { %371 = vst [vmem:[#allocation17] sm:$0xff] %v369_v45  ;;  %v370_v47 = vadd.f32 %v368_v44, %v366_v46 }
 0x21c   :  { %372 = vst [vmem:[#allocation17 + $0x8] sm:$0xff] %v370_v47 }
 0x21d   :  { %673 = shalt.err (!%p670_p6)
}
 0x21e   :  { %s674_s18 = scalar_lea.hbm %s910_s9, 256 }
 0x21f   :  { %p675_p7 = scmp.ne.s32.totalorder %s910_s9, %s674_s18  ;;  %p678_p8 = scmp.lt.u32.totalorder %s674_s18, %s910_s9 }
 0x221   :  { %p680_p9 = pnand %p678_p8, %p675_p7 }
 0x223   :  { %683 = shalt.err (!%p680_p9)
}
 0x224   :  { %384 = dma.vmem_to_hbm [thread:$0]  %s379_s11, 256, %s910_s9, [#allocation4], %s697_s19, %s697_s19, %s698_s20  }
 0x225   :  { %694 = dma.done.wait [#allocation4], 256  }
 0x226   :  { %695 = vsyncadd [#allocation4], 4294967040 }
 0x227   :  { %388 = vsyncpa [#allocation3], 1 }
 0x228   :  { %389 = vsyncpa [#allocation6], 1 }
 0x229   :  { %390 = vsyncpa [#allocation9], 1 }
 0x22a   :  { %391 = vsyncpa [#allocation12], 1 }
 0x22b   :  { %392 = vsyncpa [#allocation15], 1 }
 0x22c   :  { %393 = vsyncpa [#allocation4], 1 }

</bundles_post_ra>
